<compile_context>
chip_gen: v7x
topology: tpu7x:2x2x1
jax: 0.10.0
libtpu: 0.0.40
codegen_flags: <defaults>
</compile_context>

<pallas_src>
import functools

import jax
import jax.numpy as jnp
import numpy as np
from jax.experimental import pallas as pl
from jax.experimental.pallas import tpu as pltpu


def _convlstm_kernel(p_ref, w_ref, b_ref, c_ref, h_out_ref, c_out_ref, *, Hd):
    # Transposed (channel-major) layout: channels on sublanes, pixels on lanes.
    #   p_ref:     (KTOT, TM)   bf16  im2col patches (tap-major, channel-minor)
    #   w_ref:     (4*Hd, KTOT) bf16  conv weight as a single matmul operand
    #   b_ref:     (4*Hd, 1)    f32   bias (lane-broadcast)
    #   c_ref:     (Hd, TM)     f32   current cell state
    #   h_out_ref: (Hd, TM)     f32
    #   c_out_ref: (Hd, TM)     f32
    # Single fat MXU matmul (K = KH*KW*Cc), f32 accumulation.
    acc = jnp.dot(w_ref[...], p_ref[...],
                  preferred_element_type=jnp.float32)          # (4*Hd, TM)
    acc = acc + b_ref[...]                                      # lane broadcast

    # Gates live on sublane bands [0,Hd)=i, [Hd,2Hd)=f, [2Hd,3Hd)=o, [3Hd,4Hd)=g
    # (matches torch.split(combined_conv, hidden_dim, dim=1)).
    # sigmoid(x) = 0.5*tanh(x/2) + 0.5 -> one EUP transcendental per element.
    sig = 0.5 * jnp.tanh(0.5 * acc[0:3 * Hd, :]) + 0.5          # (3*Hd, TM)
    g = jnp.tanh(acc[3 * Hd:4 * Hd, :])                         # (Hd, TM)
    i = sig[0 * Hd:1 * Hd, :]
    f = sig[1 * Hd:2 * Hd, :]
    o = sig[2 * Hd:3 * Hd, :]

    c_next = f * c_ref[...] + i * g
    h_next = o * jnp.tanh(c_next)

    # Full-width (TM-lane) unmasked stores.
    c_out_ref[...] = c_next.astype(c_out_ref.dtype)
    h_out_ref[...] = h_next.astype(h_out_ref.dtype)


def convlstm_forward(x_nchw, weight, bias, hidden_state=None,
                     *, hidden_dim=32, kernel_size=(3, 3)):
    """Matches ConvLSTM.forward: returns (h_next, c_next) in NCHW.

    x_nchw:  (B, C_in, H, W) float32
    weight:  (4*hidden_dim, C_in + hidden_dim, KH, KW)  -- PyTorch Conv2d layout
    bias:    (4*hidden_dim,)
    hidden_state: optional (h, c) each (B, hidden_dim, H, W); defaults to zeros.
    """
    B, Cin, H, W = x_nchw.shape
    KH, KW = kernel_size
    Hd = hidden_dim
    Cc = Cin + Hd
    KTOT = KH * KW * Cc
    HW = H * W
    rows = B * HW                      # batch flattened into the pixel axis

    if hidden_state is None:
        h_cur = jnp.zeros((B, Hd, H, W), x_nchw.dtype)
        c_cur = jnp.zeros((B, Hd, H, W), x_nchw.dtype)
    else:
        h_cur, c_cur = hidden_state

    # concat([x, h]) along channels + SAME padding (NCHW, once per call).
    combined = jnp.concatenate([x_nchw, h_cur], axis=1)          # (B, Cc, H, W)
    ph, pw = KH // 2, KW // 2
    xpad = jnp.pad(combined, ((0, 0), (0, 0), (ph, ph), (pw, pw)))

    # Transposed im2col:
    #   patches_t[(kh*KW+kw)*Cc + c, b*HW + y*W + x] = xpad[b, c, y+kh, x+kw]
    # TODO(synk): for large H*W avoid materializing the 9x-inflated im2col
    # tensor in HBM; build the TM-pixel patch slab in VMEM from a halo'd block.
    cols = [xpad[:, :, kh:kh + H, kw:kw + W]
            for kh in range(KH) for kw in range(KW)]             # (B,Cc,H,W) x 9
    patches_t = jnp.stack(cols, axis=0)                          # (9, B, Cc, H, W)
    patches_t = jnp.transpose(patches_t, (0, 2, 1, 3, 4))        # (9, Cc, B, H, W)
    patches_t = patches_t.reshape(KTOT, rows).astype(jnp.bfloat16)

    # Conv2d weight (O, I, KH, KW) -> (O, KH, KW, I) -> (4*Hd, KTOT); K ordering
    # (tap-major, channel-minor) matches patches_t above.
    w_lhs = jnp.transpose(weight, (0, 2, 3, 1)).reshape(4 * Hd, KTOT)
    w_lhs = w_lhs.astype(jnp.bfloat16)
    b_col = bias.reshape(4 * Hd, 1).astype(jnp.float32)

    # Cell state, channel-major flat (Hd, B*HW): lane-dense loads/stores.
    # NOTE: this is always a freshly created internal array, which makes the
    # input_output_aliases={3: 1} below safe (the caller's c is never donated).
    c_t = jnp.transpose(c_cur, (1, 0, 2, 3)).reshape(Hd, rows)
    c_t = c_t.astype(jnp.float32)

    # Pixel tiling along the lane axis: coarse tiles (128/256/512), padded to a
    # multiple of TM so odd spatial sizes never force a single giant block.
    # Keep >= 2 grid points when enough pixels exist (v7x has 2 TensorCores).
    if rows >= 2048:
        TM = 512
    elif rows >= 512:
        TM = 256
    else:
        TM = 128
    rows_p = ((rows + TM - 1) // TM) * TM
    if rows_p != rows:
        pad = rows_p - rows
        patches_t = jnp.pad(patches_t, ((0, 0), (0, pad)))
        c_t = jnp.pad(c_t, ((0, 0), (0, pad)))

    grid = (rows_p // TM,)
    kernel = functools.partial(_convlstm_kernel, Hd=Hd)

    h_t, c_next_t = pl.pallas_call(
        kernel,
        out_shape=(jax.ShapeDtypeStruct((Hd, rows_p), jnp.float32),
                   jax.ShapeDtypeStruct((Hd, rows_p), jnp.float32)),
        grid_spec=pltpu.PrefetchScalarGridSpec(
            num_scalar_prefetch=0,
            grid=grid,
            in_specs=[
                pl.BlockSpec((KTOT, TM), lambda m: (0, m)),
                # Grid-invariant operands: single-buffered (constant index_map).
                pl.BlockSpec((4 * Hd, KTOT), lambda m: (0, 0),
                             pipeline_mode=pl.Buffered(1)),
                pl.BlockSpec((4 * Hd, 1), lambda m: (0, 0),
                             pipeline_mode=pl.Buffered(1)),
                pl.BlockSpec((Hd, TM), lambda m: (0, m)),
            ],
            out_specs=[
                pl.BlockSpec((Hd, TM), lambda m: (0, m)),
                pl.BlockSpec((Hd, TM), lambda m: (0, m)),
            ],
        ),
        compiler_params=pltpu.CompilerParams(
            dimension_semantics=("parallel",)),
        # c_next writes back into the (freshly created) cell-state buffer.
        input_output_aliases={3: 1},
    )(patches_t, w_lhs, b_col, c_t)

    # Channel-major flat -> NCHW glue to match the PyTorch module's return.
    h_t = h_t[:, :rows]
    c_next_t = c_next_t[:, :rows]
    h_out = jnp.transpose(h_t.reshape(Hd, B, H, W), (1, 0, 2, 3))
    c_out = jnp.transpose(c_next_t.reshape(Hd, B, H, W), (1, 0, 2, 3))
    return h_out, c_out


def _reference_forward(x, weight, bias, hidden_dim):
    """Pure-JAX f32 reference (same math as the PyTorch module)."""
    B, Cin, H, W = x.shape
    h = jnp.zeros((B, hidden_dim, H, W), x.dtype)
    c = jnp.zeros((B, hidden_dim, H, W), x.dtype)
    combined = jnp.concatenate([x, h], axis=1)
    out = jax.lax.conv_general_dilated(
        combined, weight, window_strides=(1, 1), padding="SAME",
        dimension_numbers=("NCHW", "OIHW", "NCHW"))
    out = out + bias[None, :, None, None]
    cc_i, cc_f, cc_o, cc_g = jnp.split(out, 4, axis=1)
    i = jax.nn.sigmoid(cc_i)
    f = jax.nn.sigmoid(cc_f)
    o = jax.nn.sigmoid(cc_o)
    g = jnp.tanh(cc_g)
    c_next = f * c + i * g
    h_next = o * jnp.tanh(c_next)
    return h_next, c_next


if __name__ == "__main__":
    # Small deterministic shapes consistent with ConvLSTM(input_dim=4, hidden_dim=32)
    B, Cin, H, W = 2, 4, 16, 16
    Hd = 32
    KH = KW = 3

    key = jax.random.PRNGKey(0)
    k_x, k_w, k_b = jax.random.split(key, 3)

    x = jax.random.normal(k_x, (B, Cin, H, W), dtype=jnp.float32)
    fan_in = (Cin + Hd) * KH * KW
    bound = 1.0 / np.sqrt(fan_in)
    weight = jax.random.uniform(k_w, (4 * Hd, Cin + Hd, KH, KW),
                                minval=-bound, maxval=bound, dtype=jnp.float32)
    bias = jax.random.uniform(k_b, (4 * Hd,),
                              minval=-bound, maxval=bound, dtype=jnp.float32)

    fwd = jax.jit(functools.partial(convlstm_forward,
                                    hidden_dim=Hd, kernel_size=(KH, KW)))
    h_out, c_out = fwd(x, weight, bias)
    h_out = jax.block_until_ready(h_out)
    c_out = jax.block_until_ready(c_out)

    h_expect, c_expect = _reference_forward(x, weight, bias, Hd)
    # bf16 matmul operands (f32 accumulation) vs f32 reference -> relaxed tol.
    np.testing.assert_allclose(np.asarray(h_out), np.asarray(h_expect),
                               rtol=2e-2, atol=2e-2)
    np.testing.assert_allclose(np.asarray(c_out), np.asarray(c_expect),
                               rtol=2e-2, atol=2e-2)

    print("KERNEL_OK")
</pallas_src>

<mosaic_0001>
module attributes {stable_mosaic.version = 11 : i64} {
  func.func @_convlstm_kernel(%arg0: i32, %arg1: memref<324x256xbf16, #tpu.memory_space<vmem>>, %arg2: memref<128x324xbf16, #tpu.memory_space<vmem>>, %arg3: memref<128x1xf32, #tpu.memory_space<vmem>>, %arg4: memref<32x256xf32, #tpu.memory_space<vmem>>, %arg5: memref<32x256xf32, #tpu.memory_space<vmem>>, %arg6: memref<32x256xf32, #tpu.memory_space<vmem>>) attributes {dimension_semantics = [#tpu.dimension_semantics<parallel>], iteration_bounds = array<i64: 2>, scalar_prefetch = 0 : i64, scratch_operands = 0 : i64, tpu.core_type = #tpu.core_type<tc>, window_params = [{transform_indices = @transform_0, window_bounds = array<i64: 324, 256>}, {pipeline_mode = #tpu.pipeline_mode<synchronous>, transform_indices = @transform_1, window_bounds = array<i64: 128, 324>}, {pipeline_mode = #tpu.pipeline_mode<synchronous>, transform_indices = @transform_2, window_bounds = array<i64: 128, 1>}, {transform_indices = @transform_3, window_bounds = array<i64: 32, 256>}, {transform_indices = @transform_4, window_bounds = array<i64: 32, 256>}, {transform_indices = @transform_5, window_bounds = array<i64: 32, 256>}]} {
    %c0 = arith.constant 0 : index
    %c0_0 = arith.constant 0 : index
    %0 = vector.load %arg2[%c0, %c0_0] : memref<128x324xbf16, #tpu.memory_space<vmem>>, vector<128x324xbf16>
    %c0_1 = arith.constant 0 : index
    %c0_2 = arith.constant 0 : index
    %1 = vector.load %arg1[%c0_1, %c0_2] : memref<324x256xbf16, #tpu.memory_space<vmem>>, vector<324x256xbf16>
    %cst = arith.constant dense<0.000000e+00> : vector<128x256xf32>
    %2 = tpu.matmul %0, %1, %cst {dimension_numbers = #tpu.dot_dimension_numbers<[1], [0], [0], [1], [0, 0, 1, 1], [], []>} : vector<128x324xbf16>, vector<324x256xbf16>, vector<128x256xf32> -> vector<128x256xf32>
    %c0_3 = arith.constant 0 : index
    %c0_4 = arith.constant 0 : index
    %3 = vector.load %arg3[%c0_3, %c0_4] : memref<128x1xf32, #tpu.memory_space<vmem>>, vector<128x1xf32>
    %4 = vector.broadcast %3 : vector<128x1xf32> to vector<128x256xf32>
    %5 = arith.addf %2, %4 : vector<128x256xf32>
    %6 = vector.extract_strided_slice %5 {offsets = [0, 0], sizes = [96, 256], strides = [1, 1]} : vector<128x256xf32> to vector<96x256xf32>
    %cst_5 = arith.constant 5.000000e-01 : f32
    %7 = vector.broadcast %cst_5 : f32 to vector<96x256xf32>
    %8 = arith.mulf %7, %6 : vector<96x256xf32>
    %9 = math.tanh %8 : vector<96x256xf32>
    %cst_6 = arith.constant 5.000000e-01 : f32
    %10 = vector.broadcast %cst_6 : f32 to vector<96x256xf32>
    %11 = arith.mulf %10, %9 : vector<96x256xf32>
    %cst_7 = arith.constant 5.000000e-01 : f32
    %12 = vector.broadcast %cst_7 : f32 to vector<96x256xf32>
    %13 = arith.addf %11, %12 : vector<96x256xf32>
    %14 = vector.extract_strided_slice %5 {offsets = [96, 0], sizes = [32, 256], strides = [1, 1]} : vector<128x256xf32> to vector<32x256xf32>
    %15 = math.tanh %14 : vector<32x256xf32>
    %16 = vector.extract_strided_slice %13 {offsets = [0, 0], sizes = [32, 256], strides = [1, 1]} : vector<96x256xf32> to vector<32x256xf32>
    %17 = vector.extract_strided_slice %13 {offsets = [32, 0], sizes = [32, 256], strides = [1, 1]} : vector<96x256xf32> to vector<32x256xf32>
    %18 = vector.extract_strided_slice %13 {offsets = [64, 0], sizes = [32, 256], strides = [1, 1]} : vector<96x256xf32> to vector<32x256xf32>
    %c0_8 = arith.constant 0 : index
    %c0_9 = arith.constant 0 : index
    %19 = vector.load %arg4[%c0_8, %c0_9] : memref<32x256xf32, #tpu.memory_space<vmem>>, vector<32x256xf32>
    %20 = arith.mulf %17, %19 : vector<32x256xf32>
    %21 = arith.mulf %16, %15 : vector<32x256xf32>
    %22 = arith.addf %20, %21 : vector<32x256xf32>
    %23 = math.tanh %22 : vector<32x256xf32>
    %24 = arith.mulf %18, %23 : vector<32x256xf32>
    %c0_10 = arith.constant 0 : index
    %c0_11 = arith.constant 0 : index
    %25 = vector.load %arg6[%c0_10, %c0_11] : memref<32x256xf32, #tpu.memory_space<vmem>>, vector<32x256xf32>
    tpu.vector_store %arg6[%c0_10, %c0_11], %22 {strides = array<i32>} : memref<32x256xf32, #tpu.memory_space<vmem>>, vector<32x256xf32>,
    %c0_12 = arith.constant 0 : index
    %c0_13 = arith.constant 0 : index
    %26 = vector.load %arg5[%c0_12, %c0_13] : memref<32x256xf32, #tpu.memory_space<vmem>>, vector<32x256xf32>
    tpu.vector_store %arg5[%c0_12, %c0_13], %24 {strides = array<i32>} : memref<32x256xf32, #tpu.memory_space<vmem>>, vector<32x256xf32>,
    return
  }
  func.func @transform_0(%arg0: i32) -> (i32, i32) {
    %c0_i32 = arith.constant 0 : i32
    %c0_i32_0 = arith.constant 0 : i32
    return %c0_i32, %arg0 : i32, i32
  }
  func.func @transform_1(%arg0: i32) -> (i32, i32) {
    %c0_i32 = arith.constant 0 : i32
    %c0_i32_0 = arith.constant 0 : i32
    %c0_i32_1 = arith.constant 0 : i32
    return %c0_i32, %c0_i32_0 : i32, i32
  }
  func.func @transform_2(%arg0: i32) -> (i32, i32) {
    %c0_i32 = arith.constant 0 : i32
    %c0_i32_0 = arith.constant 0 : i32
    %c0_i32_1 = arith.constant 0 : i32
    return %c0_i32, %c0_i32_0 : i32, i32
  }
  func.func @transform_3(%arg0: i32) -> (i32, i32) {
    %c0_i32 = arith.constant 0 : i32
    %c0_i32_0 = arith.constant 0 : i32
    return %c0_i32, %arg0 : i32, i32
  }
  func.func @transform_4(%arg0: i32) -> (i32, i32) {
    %c0_i32 = arith.constant 0 : i32
    %c0_i32_0 = arith.constant 0 : i32
    return %c0_i32, %arg0 : i32, i32
  }
  func.func @transform_5(%arg0: i32) -> (i32, i32) {
    %c0_i32 = arith.constant 0 : i32
    %c0_i32_0 = arith.constant 0 : i32
    return %c0_i32, %arg0 : i32, i32
  }
}

</mosaic_0001>

<bundles_post_ra>
// kernel: convlstm_forward.1
= control target key start
LH: loop header
LB: loop body
LE: loop exit
PB: predicated region body
PF: predicated region fallthrough
CT: control target
= control target key end

     0   :  { %s2006_s18 = smov 0   ;;  %s2008_s19 = smov 0   ;;  %s2540_s0 = inlined_call_operand.vmem [shape: bf16[324,512], index: 0, kind: input, shape index: {}]   ;;  %s2541_s1 = inlined_call_operand.vmem [shape: bf16[128,324], index: 1, kind: input, shape index: {}]   ;;  %s2542_s2 = inlined_call_operand.vmem [shape: f32[128,1], index: 2, kind: input, shape index: {}]   ;;  %s2543_s3 = inlined_call_operand.vmem [shape: f32[32,512], index: 3, kind: input, shape index: {}, may-alias: {3,5}]   ;;  %s2544_s4 = inlined_call_operand.vmem [shape: f32[32,512], index: 4, kind: output, shape index: {0}]   ;;  %s2545_s5 = inlined_call_operand.vmem [shape: f32[32,512], index: 5, kind: output, shape index: {1}, may-alias: {3,5}]  }
   0x1   :  { %s2010_s20 = smov 0  }
   0x2 LB: > { %s2022_s21 = sadd.s32 4294967295, %s1973_s20   ;;  %s2025_s22 = sadd.s32 1, %s1973_s20   ;;  %s1973_s20 = sphi %s2010_s20, %s2550_s20   ;;  %s1969_s19 = sphi %s2008_s19, %s2549_s19   ;;  %s1965_s18 = sphi %s2006_s18, %s2548_s18  }
   0x3   : > { %s20_s23 = ssub.s32 %s1973_s20, %s2025_s22  ;;  %s23_s24 = sadd.s32 1, %s1969_s19 }
   0x4   : > { %p21_p0 = scmp.eq.s32.totalorder %s20_s23, 0  ;;  %p30_p1 = scmp.ne.s32.totalorder %s1969_s19, %s1965_s18 }
   0x5   : > { %p31_p2 = scmp.eq.s32.totalorder %s1973_s20, 0  ;;  %p128_p3 = scmp.eq.s32.totalorder %s2022_s21, 1 }
   0x6   : > { %s2035_s25 = scalar_select %p21_p0, %s1969_s19, %s23_s24  }
   0x7   : > { %p2037_p4 = por %p31_p2, %p30_p1  ;;  %p2041_p5 = por %p128_p3, %p30_p1 }
   0x8   : > { %p1587_p6 = scmp.ge.s32.totalorder %s1973_s20, 2 }
   0xa   : > { %182 = sbr.rel (%p1587_p6) target bundleno = 50 (0x32), region = 24 }
  0x11   : > { %185 = sbr.rel (!%p2037_p4) target bundleno = 42 (0x2a), region = 28  ;;  %s187_s28 = sand.u32 (%p2037_p4), 1, %s1969_s19  }
  0x12   : > { %s1680_s29 = sshll.u32 (%p2037_p4), %s1973_s20, 3  ;;  %s1748_s30 = smul.u32 (%p2037_p4), 328, %s187_s28 }
  0x13   : > { %s2053_s8 = scalar_lea.vmem (%p2037_p4), %s2540_s0, %s1680_s29 }
  0x14   : > { %v300_v0 = vld [vmem:[%s2053_s8] sm:$0xff] (%p2037_p4)  ;;  %v302_v1 = vld [vmem:[%s2053_s8 + $0x10] sm:$0xff] (%p2037_p4)  ;;  %s2061_s9 = scalar_lea.vmem (%p2037_p4), [#allocation2], %s1748_s30 }
  0x15   : > { %v304_v2 = vld [vmem:[%s2053_s8 + $0x20] sm:$0xff] (%p2037_p4)  ;;  %v306_v3 = vld [vmem:[%s2053_s8 + $0x30] sm:$0xff] (%p2037_p4)  ;;  %301 = vst [vmem:[%s2061_s9] sm:$0xff] (%p2037_p4), %v300_v0  ;;  %303 = vst [vmem:[%s2061_s9 + $0x8] sm:$0xff] (%p2037_p4), %v302_v1 }
  0x16   : > { %v308_v4 = vld [vmem:[%s2053_s8 + $0x40] sm:$0xff] (%p2037_p4)  ;;  %v310_v5 = vld [vmem:[%s2053_s8 + $0x50] sm:$0xff] (%p2037_p4)  ;;  %305 = vst [vmem:[%s2061_s9 + $0x10] sm:$0xff] (%p2037_p4), %v304_v2  ;;  %307 = vst [vmem:[%s2061_s9 + $0x18] sm:$0xff] (%p2037_p4), %v306_v3 }
  0x17   : > { %309 = vst [vmem:[%s2061_s9 + $0x20] sm:$0xff] (%p2037_p4), %v308_v4  ;;  %311 = vst [vmem:[%s2061_s9 + $0x28] sm:$0xff] (%p2037_p4), %v310_v5  ;;  %v312_v6 = vld [vmem:[%s2053_s8 + $0x60] sm:$0xff] (%p2037_p4)  ;;  %v314_v7 = vld [vmem:[%s2053_s8 + $0x70] sm:$0xff] (%p2037_p4) }
  0x18   : > { %v316_v8 = vld [vmem:[%s2053_s8 + $0x80] sm:$0xff]  ;;  %313 = vst [vmem:[%s2061_s9 + $0x30] sm:$0xff] %v312_v6  ;;  %315 = vst [vmem:[%s2061_s9 + $0x38] sm:$0xff] %v314_v7  ;;  %v318_v9 = vld [vmem:[%s2053_s8 + $0x90] sm:$0xff] }
  0x19   : > { %317 = vst [vmem:[%s2061_s9 + $0x40] sm:$0xff] %v316_v8  ;;  %v320_v10 = vld [vmem:[%s2053_s8 + $0xa0] sm:$0xff]  ;;  %v322_v11 = vld [vmem:[%s2053_s8 + $0xb0] sm:$0xff]  ;;  %319 = vst [vmem:[%s2061_s9 + $0x48] sm:$0xff] %v318_v9 }
  0x1a   : > { %321 = vst [vmem:[%s2061_s9 + $0x50] sm:$0xff] %v320_v10  ;;  %323 = vst [vmem:[%s2061_s9 + $0x58] sm:$0xff] %v322_v11  ;;  %v324_v12 = vld [vmem:[%s2053_s8 + $0xc0] sm:$0xff]  ;;  %v326_v13 = vld [vmem:[%s2053_s8 + $0xd0] sm:$0xff] }
  0x1b   : > { %v328_v14 = vld [vmem:[%s2053_s8 + $0xe0] sm:$0xff]  ;;  %325 = vst [vmem:[%s2061_s9 + $0x60] sm:$0xff] %v324_v12  ;;  %327 = vst [vmem:[%s2061_s9 + $0x68] sm:$0xff] %v326_v13  ;;  %v330_v15 = vld [vmem:[%s2053_s8 + $0xf0] sm:$0xff] }
  0x1c   : > { %329 = vst [vmem:[%s2061_s9 + $0x70] sm:$0xff] %v328_v14  ;;  %v332_v16 = vld [vmem:[%s2053_s8 + $0x100] sm:$0xff]  ;;  %v334_v17 = vld [vmem:[%s2053_s8 + $0x110] sm:$0xff]  ;;  %331 = vst [vmem:[%s2061_s9 + $0x78] sm:$0xff] %v330_v15 }
  0x1d   : > { %333 = vst [vmem:[%s2061_s9 + $0x80] sm:$0xff] %v332_v16  ;;  %335 = vst [vmem:[%s2061_s9 + $0x88] sm:$0xff] %v334_v17  ;;  %v336_v18 = vld [vmem:[%s2053_s8 + $0x120] sm:$0xff]  ;;  %v338_v19 = vld [vmem:[%s2053_s8 + $0x130] sm:$0xff] }
  0x1e   : > { %v340_v20 = vld [vmem:[%s2053_s8 + $0x140] sm:$0xff]  ;;  %337 = vst [vmem:[%s2061_s9 + $0x90] sm:$0xff] %v336_v18  ;;  %339 = vst [vmem:[%s2061_s9 + $0x98] sm:$0xff] %v338_v19  ;;  %v342_v21 = vld [vmem:[%s2053_s8 + $0x150] sm:$0xff] }
  0x1f   : > { %341 = vst [vmem:[%s2061_s9 + $0xa0] sm:$0xff] %v340_v20  ;;  %v344_v22 = vld [vmem:[%s2053_s8 + $0x160] sm:$0xff]  ;;  %v346_v23 = vld [vmem:[%s2053_s8 + $0x170] sm:$0xff]  ;;  %343 = vst [vmem:[%s2061_s9 + $0xa8] sm:$0xff] %v342_v21 }
  0x20   : > { %345 = vst [vmem:[%s2061_s9 + $0xb0] sm:$0xff] %v344_v22  ;;  %347 = vst [vmem:[%s2061_s9 + $0xb8] sm:$0xff] %v346_v23  ;;  %v348_v24 = vld [vmem:[%s2053_s8 + $0x180] sm:$0xff]  ;;  %v350_v25 = vld [vmem:[%s2053_s8 + $0x190] sm:$0xff] }
  0x21   : > { %v352_v26 = vld [vmem:[%s2053_s8 + $0x1a0] sm:$0xff]  ;;  %349 = vst [vmem:[%s2061_s9 + $0xc0] sm:$0xff] %v348_v24  ;;  %351 = vst [vmem:[%s2061_s9 + $0xc8] sm:$0xff] %v350_v25  ;;  %v354_v27 = vld [vmem:[%s2053_s8 + $0x1b0] sm:$0xff] }
  0x22   : > { %353 = vst [vmem:[%s2061_s9 + $0xd0] sm:$0xff] %v352_v26  ;;  %v356_v28 = vld [vmem:[%s2053_s8 + $0x1c0] sm:$0xff]  ;;  %v358_v29 = vld [vmem:[%s2053_s8 + $0x1d0] sm:$0xff]  ;;  %355 = vst [vmem:[%s2061_s9 + $0xd8] sm:$0xff] %v354_v27 }
  0x23   : > { %357 = vst [vmem:[%s2061_s9 + $0xe0] sm:$0xff] %v356_v28  ;;  %359 = vst [vmem:[%s2061_s9 + $0xe8] sm:$0xff] %v358_v29  ;;  %v360_v30 = vld [vmem:[%s2053_s8 + $0x1e0] sm:$0xff]  ;;  %v362_v31 = vld [vmem:[%s2053_s8 + $0x1f0] sm:$0xff] }
  0x24   : > { %v364_v32 = vld [vmem:[%s2053_s8 + $0x200] sm:$0xff]  ;;  %361 = vst [vmem:[%s2061_s9 + $0xf0] sm:$0xff] %v360_v30  ;;  %363 = vst [vmem:[%s2061_s9 + $0xf8] sm:$0xff] %v362_v31  ;;  %v366_v33 = vld [vmem:[%s2053_s8 + $0x210] sm:$0xff] }
  0x25   : > { %365 = vst [vmem:[%s2061_s9 + $0x100] sm:$0xff] %v364_v32  ;;  %v368_v34 = vld [vmem:[%s2053_s8 + $0x220] sm:$0xff]  ;;  %v370_v35 = vld [vmem:[%s2053_s8 + $0x230] sm:$0xff]  ;;  %367 = vst [vmem:[%s2061_s9 + $0x108] sm:$0xff] %v366_v33 }
  0x26   : > { %369 = vst [vmem:[%s2061_s9 + $0x110] sm:$0xff] %v368_v34  ;;  %371 = vst [vmem:[%s2061_s9 + $0x118] sm:$0xff] %v370_v35  ;;  %v372_v36 = vld [vmem:[%s2053_s8 + $0x240] sm:$0xff]  ;;  %v374_v37 = vld [vmem:[%s2053_s8 + $0x250] sm:$0xff] }
  0x27   : > { %v376_v38 = vld [vmem:[%s2053_s8 + $0x260] sm:$0xff]  ;;  %373 = vst [vmem:[%s2061_s9 + $0x120] sm:$0xff] %v372_v36  ;;  %375 = vst [vmem:[%s2061_s9 + $0x128] sm:$0xff] %v374_v37  ;;  %v378_v39 = vld [vmem:[%s2053_s8 + $0x270] sm:$0xff] }
  0x28   : > { %377 = vst [vmem:[%s2061_s9 + $0x130] sm:$0xff] %v376_v38  ;;  %v380_v40 = vld [vmem:[%s2053_s8 + $0x280] sm:$0xff]  ;;  %379 = vst [vmem:[%s2061_s9 + $0x138] sm:$0xff] %v378_v39 }
  0x29   : > { %381 = vst [vmem:[%s2061_s9 + $0x140] sm:$0xff] %v380_v40 }
  0x2a PF: > { %387 = sbr.rel (!%p2037_p4) target bundleno = 50 (0x32), region = 66  ;;  %s389_s10 = sand.u32 (%p2037_p4), 1, %s1969_s19  }
  0x2b   : > { %s1681_s11 = sshll.u32 (%p2037_p4), %s1973_s20, 4  ;;  %s1590_s12 = sshll.u32 (%p2037_p4), %s389_s10, 6 }
  0x2c   : > { %s394_s15 = scalar_lea.vmem (%p2037_p4), %s2543_s3, %s1681_s11  ;;  %s391_s16 = scalar_lea.vmem (%p2037_p4), [#allocation3], %s1590_s12 }
  0x2d   : > { %v407_v41 = vld [vmem:[%s394_s15] sm:$0xff] (%p2037_p4)  ;;  %v409_v42 = vld [vmem:[%s394_s15 + $0x8] sm:$0xff] (%p2037_p4) }
  0x2e   : > { %v411_v43 = vld [vmem:[%s394_s15 + $0x20] sm:$0xff] (%p2037_p4)  ;;  %408 = vst [vmem:[%s391_s16] sm:$0xff] (%p2037_p4), %v407_v41  ;;  %410 = vst [vmem:[%s391_s16 + $0x8] sm:$0xff] (%p2037_p4), %v409_v42  ;;  %v413_v44 = vld [vmem:[%s394_s15 + $0x28] sm:$0xff] (%p2037_p4) }
  0x2f   : > { %412 = vst [vmem:[%s391_s16 + $0x10] sm:$0xff] (%p2037_p4), %v411_v43  ;;  %v415_v45 = vld [vmem:[%s394_s15 + $0x40] sm:$0xff] (%p2037_p4)  ;;  %v417_v46 = vld [vmem:[%s394_s15 + $0x48] sm:$0xff] (%p2037_p4)  ;;  %414 = vst [vmem:[%s391_s16 + $0x18] sm:$0xff] (%p2037_p4), %v413_v44 }
  0x30   : > { %416 = vst [vmem:[%s391_s16 + $0x20] sm:$0xff] (%p2037_p4), %v415_v45  ;;  %418 = vst [vmem:[%s391_s16 + $0x28] sm:$0xff] (%p2037_p4), %v417_v46  ;;  %v419_v47 = vld [vmem:[%s394_s15 + $0x60] sm:$0xff] (%p2037_p4)  ;;  %v421_v48 = vld [vmem:[%s394_s15 + $0x68] sm:$0xff] (%p2037_p4) }
  0x31   : > { %420 = vst [vmem:[%s391_s16 + $0x30] sm:$0xff] %v419_v47  ;;  %422 = vst [vmem:[%s391_s16 + $0x38] sm:$0xff] %v421_v48 }
  0x32 PF: > { %p1593_p7 = scmp.ge.s32.totalorder %s1973_s20, 1  ;;  %p427_p8 = scmp.lt.s32.totalorder %s1973_s20, 3 }
  0x34   : > { %p428_p9 = pnand %p1593_p7, %p427_p8 }
  0x35   : > { %s434_s17 = sand.u32 (!%p428_p9), 1, %s1965_s18   ;;  %v1975_v49 = vmov (!%p428_p9), 0   ;;  %v1841_v50 = vld [vmem:[%s2541_s1 + $0x4] ss:$12 sps:$4 sm:$0xff] (!%p428_p9)   ;;  %vm999_vm0 = vcmask (!%p428_p9), 1041408   ;;  %vm974_vm1 = vcmask (!%p428_p9), 556032  }
  0x36   : > { %431 = sbr.rel (%p428_p9) target bundleno = 442 (0x1ba), region = 89  ;;  %1151 = vmatprep.mubr.bf16.mxu0 (!%p428_p9), %v1975_v49  ;;  %1775 = vset.pattern.permute.xlu0 (!%p428_p9), %v1975_v49  ;;  %v1842_v18 = vld [vmem:[%s2541_s1 + $0x8] ss:$12 sps:$4 sm:$0xff] (!%p428_p9)   ;;  %v1845_v23 = vld [vmem:[%s2541_s1 + $0x20] ss:$12 sps:$4 sm:$0xff] (!%p428_p9)   ;;  %v556_v29 = vld [vmem:[%s2542_s2 + $0x18] sm:$0xff] (!%p428_p9) }
  0x37   : > { %s1749_s23 = smul.u32 (!%p428_p9), 328, %s434_s17  ;;  %1776 = vset.pattern.permute.xlu1 (!%p428_p9), %v1975_v49  ;;  %1038 = vmatprep.mubr.bf16.mxu1 (!%p428_p9), %v1841_v50  ;;  %v553_v24 = vld [vmem:[%s2542_s2] sm:$0xff] (!%p428_p9)  ;;  %v555_v25 = vld [vmem:[%s2542_s2 + $0x10] sm:$0xff] (!%p428_p9)  ;;  %v554_v28 = vld [vmem:[%s2542_s2 + $0x8] sm:$0xff] (!%p428_p9)  ;;  %s2440_s10 = sshll.u32 (!%p428_p9), %s434_s17, 6 }
  0x38   : > { %571 = vperm.xlu0 (!%p428_p9), %1775, %v553_v24   ;;  %581 = vperm.xlu1 (!%p428_p9), %1776, %v555_v25   ;;  %v557_v32 = vld [vmem:[%s2542_s2 + $0x20] sm:$0xff] (!%p428_p9)  ;;  %v558_v34 = vld [vmem:[%s2542_s2 + $0x28] sm:$0xff] (!%p428_p9)  ;;  %v559_v37 = vld [vmem:[%s2542_s2 + $0x30] sm:$0xff] (!%p428_p9)  ;;  %s2456_s18 = scalar_lea.vmem (!%p428_p9), [#allocation3], %s2440_s10  ;;  %s2474_s17 = scalar_lea.vmem (!%p428_p9), [#allocation5], %s2440_s10 }
  0x39   : > { %s2157_s20 = scalar_lea.vmem (!%p428_p9), [#allocation2], %s1749_s23  ;;  %v1849_v33 = vld [vmem:[%s2541_s1 + $0x38] ss:$12 sps:$4 sm:$0xff] (!%p428_p9)   ;;  %v1853_v42 = vld [vmem:[%s2541_s1 + $0x50] ss:$12 sps:$4 sm:$0xff] (!%p428_p9)   ;;  %v566_v43 = vld [vmem:[%s2542_s2 + $0x68] sm:$0xff] (!%p428_p9) }
  0x3a   : > { %v1777_v51 = vld [vmem:[%s2157_s20 + $0x4] ss:$8 sps:$4 sm:$0xff] (!%p428_p9)   ;;  %v1779_v52 = vld [vmem:[%s2157_s20] ss:$8 sps:$4 sm:$0xff] (!%p428_p9)   ;;  %v1780_v53 = vld [vmem:[%s2157_s20 + $0x14] ss:$8 sps:$4 sm:$0xff] (!%p428_p9)  }
  0x3b   : > { %1006 = vmatprep.subr.bf16.mxu1 (!%p428_p9), %v1777_v51  ;;  %v1782_v54 = vld [vmem:[%s2157_s20 + $0x10] ss:$8 sps:$4 sm:$0xff] (!%p428_p9)   ;;  %v1783_v55 = vld [vmem:[%s2157_s20 + $0x24] ss:$8 sps:$4 sm:$0xff] (!%p428_p9)   ;;  %v1785_v56 = vld [vmem:[%s2157_s20 + $0x20] ss:$8 sps:$4 sm:$0xff] (!%p428_p9)  }
  0x3c   : > { %1007 = vmatpush1.bf16.msra.mxu1 (!%p428_p9), %v1779_v52  ;;  %v1786_v57 = vld [vmem:[%s2157_s20 + $0x34] ss:$8 sps:$4 sm:$0xff] (!%p428_p9)   ;;  %v1788_v58 = vld [vmem:[%s2157_s20 + $0x30] ss:$8 sps:$4 sm:$0xff] (!%p428_p9)   ;;  %v1789_v59 = vld [vmem:[%s2157_s20 + $0x44] ss:$8 sps:$4 sm:$0xff] (!%p428_p9)   ;;  %576 = vperm.xlu0 (!%p428_p9), %1775, %v554_v28  }
  0x3d   : > { %1008 = vmatprep.subr.bf16.mxu1 %v1780_v53  ;;  %v1791_v60 = vld [vmem:[%s2157_s20 + $0x40] ss:$8 sps:$4 sm:$0xff]   ;;  %v1810_v61 = vld [vmem:[%s2157_s20 + $0x104] ss:$8 sps:$4 sm:$0xff]   ;;  %v1792_v62 = vld [vmem:[%s2157_s20 + $0x54] ss:$8 sps:$4 sm:$0xff]   ;;  %586 = vperm.xlu1 %1776, %v556_v29  }
  0x3e   : > { %v1814_v63 = vld [vmem:[%s2157_s20 + $0x100] ss:$8 sps:$4 sm:$0xff]   ;;  %1119 = vmatprep.subr.bf16.mxu0 %v1810_v61  ;;  %v1816_v0 = vld [vmem:[%s2157_s20 + $0x114] ss:$8 sps:$4 sm:$0xff]   ;;  %v1794_v1 = vld [vmem:[%s2157_s20 + $0x50] ss:$8 sps:$4 sm:$0xff]  }
  0x3f   : > { %1120 = vmatpush1.bf16.msra.mxu0 %v1814_v63  ;;  %v1795_v2 = vld [vmem:[%s2157_s20 + $0x64] ss:$8 sps:$4 sm:$0xff]   ;;  %v1820_v3 = vld [vmem:[%s2157_s20 + $0x110] ss:$8 sps:$4 sm:$0xff]   ;;  %v1797_v5 = vld [vmem:[%s2157_s20 + $0x60] ss:$8 sps:$4 sm:$0xff]  }
  0x40   : > { %1009 = vmatpush1.bf16.msra.mxu1 %v1782_v54  ;;  %1121 = vmatprep.subr.bf16.mxu0 %v1816_v0  ;;  %v1822_v4 = vld [vmem:[%s2157_s20 + $0x124] ss:$8 sps:$4 sm:$0xff]   ;;  %v1826_v6 = vld [vmem:[%s2157_s20 + $0x120] ss:$8 sps:$4 sm:$0xff]   ;;  %v1828_v7 = vld [vmem:[%s2157_s20 + $0x134] ss:$8 sps:$4 sm:$0xff]  }
  0x41   : > { %1010 = vmatprep.subr.bf16.mxu1 %v1783_v55  ;;  %v1798_v8 = vld [vmem:[%s2157_s20 + $0x74] ss:$8 sps:$4 sm:$0xff]   ;;  %v552_v9 = vld [vmem:[%s2157_s20 + $0x140] sm:$0x33]  ;;  %v1832_v10 = vld [vmem:[%s2157_s20 + $0x130] ss:$8 sps:$4 sm:$0xff]   ;;  %591 = vperm.xlu0 %1775, %v557_v32  }
  0x42   : > { %v1800_v11 = vld [vmem:[%s2157_s20 + $0x70] ss:$8 sps:$4 sm:$0xff]   ;;  %v1662_v12 = vcombine.high %v552_v9, %v552_v9  ;;  %v1661_v13 = vcombine.low %v552_v9, %v552_v9  ;;  %v1801_v14 = vld [vmem:[%s2157_s20 + $0x84] ss:$8 sps:$4 sm:$0xff]   ;;  %v1803_v15 = vld [vmem:[%s2157_s20 + $0x80] ss:$8 sps:$4 sm:$0xff]   ;;  %596 = vperm.xlu1 %1776, %v558_v34  }
  0x43   : > { %1122 = vmatpush1.bf16.msra.mxu0 %v1820_v3  ;;  %v1804_v17 = vld [vmem:[%s2157_s20 + $0x94] ss:$8 sps:$4 sm:$0xff]   ;;  %v1806_v19 = vld [vmem:[%s2157_s20 + $0x90] ss:$8 sps:$4 sm:$0xff]   ;;  %v1807_v20 = vld [vmem:[%s2157_s20 + $0xa4] ss:$8 sps:$4 sm:$0xff]  }
  0x44   : > { %1011 = vmatpush1.bf16.msra.mxu1 %v1785_v56  ;;  %1123 = vmatprep.subr.bf16.mxu0 %v1822_v4  ;;  %v1001_v16 = vsel %vm999_vm0, %v1661_v13, 0  ;;  %v1809_v21 = vld [vmem:[%s2157_s20 + $0xa0] ss:$8 sps:$4 sm:$0xff]   ;;  %v1812_v22 = vld [vmem:[%s2157_s20 + $0xb4] ss:$8 sps:$4 sm:$0xff]   ;;  %s2492_s11 = scalar_lea.vmem [#allocation4], %s2440_s10 }
  0x45   : > { %1012 = vmatprep.subr.bf16.mxu1 %v1786_v57  ;;  %v1815_v26 = vld [vmem:[%s2157_s20 + $0xb0] ss:$8 sps:$4 sm:$0xff]   ;;  %v1818_v27 = vld [vmem:[%s2157_s20 + $0xc4] ss:$8 sps:$4 sm:$0xff]   ;;  %v1821_v30 = vld [vmem:[%s2157_s20 + $0xc0] ss:$8 sps:$4 sm:$0xff]   ;;  %601 = vperm.xlu0 %1775, %v559_v37  }
  0x46   : > { %v1824_v31 = vld [vmem:[%s2157_s20 + $0xd4] ss:$8 sps:$4 sm:$0xff]   ;;  %v1827_v35 = vld [vmem:[%s2157_s20 + $0xd0] ss:$8 sps:$4 sm:$0xff]   ;;  %v1830_v36 = vld [vmem:[%s2157_s20 + $0xe4] ss:$8 sps:$4 sm:$0xff]  }
  0x47   : > { %1124 = vmatpush1.bf16.msra.mxu0 %v1826_v6  ;;  %v560_v38 = vld [vmem:[%s2542_s2 + $0x38] sm:$0xff]  ;;  %v1833_v39 = vld [vmem:[%s2157_s20 + $0xe0] ss:$8 sps:$4 sm:$0xff]   ;;  %s1682_s12 = sshll.u32 (%p2041_p5), %s2022_s21, 4 }
  0x48   : > { %1013 = vmatpush1.bf16.msra.mxu1 %v1788_v58  ;;  %1125 = vmatprep.subr.bf16.mxu0 %v1828_v7  ;;  %v1835_v40 = vld [vmem:[%s2157_s20 + $0xf4] ss:$8 sps:$4 sm:$0xff]   ;;  %v1838_v44 = vld [vmem:[%s2157_s20 + $0xf0] ss:$8 sps:$4 sm:$0xff]   ;;  %v562_v52 = vld [vmem:[%s2542_s2 + $0x48] sm:$0xff]  ;;  %s1413_s15 = scalar_lea.vmem (%p2041_p5), %s2544_s4, %s1682_s12 }
  0x49   : > { %1014 = vmatprep.subr.bf16.mxu1 %v1789_v59  ;;  %606 = vperm.xlu1 %1776, %v560_v38   ;;  %v565_v41 = vld [vmem:[%s2542_s2 + $0x60] sm:$0xff]  ;;  %v567_v45 = vld [vmem:[%s2542_s2 + $0x70] sm:$0xff]  ;;  %v568_v46 = vld [vmem:[%s2542_s2 + $0x78] sm:$0xff] }
  0x4a   : > { %631 = vperm.xlu0 %1775, %v565_v41   ;;  %v1839_v47 = vld [vmem:[%s2541_s1] ss:$12 sps:$4 sm:$0xff]   ;;  %v1843_v48 = vld [vmem:[%s2541_s1 + $0x1c] ss:$12 sps:$4 sm:$0xff]   ;;  %v563_v53 = vld [vmem:[%s2542_s2 + $0x50] sm:$0xff] }
  0x4b   : > { %1126 = vmatpush1.bf16.msra.mxu0 %v1832_v10  ;;  %v561_v50 = vld [vmem:[%s2542_s2 + $0x40] sm:$0xff]  ;;  %v1857_v51 = vld [vmem:[%s2541_s1 + $0x68] ss:$12 sps:$4 sm:$0xff]   ;;  %v564_v54 = vld [vmem:[%s2542_s2 + $0x58] sm:$0xff] }
  0x4c   : > { %1015 = vmatpush1.bf16.msra.mxu1 %v1791_v60  ;;  %1663 = vmatprep.subr.msk.bf16.mxu0 %vm999_vm0, %v1662_v12  ;;  %v1846_v55 = vld [vmem:[%s2541_s1 + $0x18] ss:$12 sps:$4 sm:$0xff]   ;;  %v1847_v56 = vld [vmem:[%s2541_s1 + $0x34] ss:$12 sps:$4 sm:$0xff]   ;;  %v1850_v58 = vld [vmem:[%s2541_s1 + $0x30] ss:$12 sps:$4 sm:$0xff]  }
  0x4d   : > { %1016 = vmatprep.subr.bf16.mxu1 %v1792_v62  ;;  %636 = vperm.xlu1 %1776, %v566_v43   ;;  %v1861_v57 = vld [vmem:[%s2541_s1 + $0x80] ss:$12 sps:$4 sm:$0xff]   ;;  %v1865_v60 = vld [vmem:[%s2541_s1 + $0x98] ss:$12 sps:$4 sm:$0xff]   ;;  %v1854_v61 = vld [vmem:[%s2541_s1 + $0x48] ss:$12 sps:$4 sm:$0xff]  }
  0x4e   : > { %641 = vperm.xlu0 %1775, %v567_v45   ;;  %v1851_v59 = vld [vmem:[%s2541_s1 + $0x4c] ss:$12 sps:$4 sm:$0xff]   ;;  %v1855_v62 = vld [vmem:[%s2541_s1 + $0x64] ss:$12 sps:$4 sm:$0xff]  }
  0x4f   : > { %1128 = vmatpush1.bf16.msra.mxu0 %v1001_v16  ;;  %v1869_v63 = vld [vmem:[%s2541_s1 + $0xb0] ss:$12 sps:$4 sm:$0xff]   ;;  %v1858_v0 = vld [vmem:[%s2541_s1 + $0x60] ss:$12 sps:$4 sm:$0xff]  }
  0x50   : > { %1017 = vmatpush1.bf16.msra.mxu1 %v1794_v1  ;;  %v1862_v1 = vld [vmem:[%s2541_s1 + $0x78] ss:$12 sps:$4 sm:$0xff]   ;;  %v1866_v3 = vld [vmem:[%s2541_s1 + $0x90] ss:$12 sps:$4 sm:$0xff]  }
  0x51   : > { %1018 = vmatprep.subr.bf16.mxu1 %v1795_v2  ;;  %646 = vperm.xlu1 %1776, %v568_v46   ;;  %v1863_v2 = vld [vmem:[%s2541_s1 + $0x94] ss:$12 sps:$4 sm:$0xff]   ;;  %v1867_v4 = vld [vmem:[%s2541_s1 + $0xac] ss:$12 sps:$4 sm:$0xff]  }
  0x52   : > { %1664 = vmatmul.mubr.msk.bf16.vlgmr.msra.gmra.mrb[0].mxu0 %vm974_vm1, %v1842_v18  ;;  %611 = vperm.xlu0 %1775, %v561_v50  }
  0x53   : > { %1161 = vmatprep.mubr.bf16.mxu0 %v1975_v49 }
  0x54   : > { %1019 = vmatpush1.bf16.msra.mxu1 %v1797_v5  ;;  %v1870_v5 = vld [vmem:[%s2541_s1 + $0xa8] ss:$12 sps:$4 sm:$0xff]  }
  0x55   : > { %1020 = vmatprep.subr.bf16.mxu1 %v1798_v8  ;;  %616 = vperm.xlu1 %1776, %v562_v52  }
  0x56   : > { %621 = vperm.xlu0 %1775, %v563_v53  }
  0x58   : > { %1021 = vmatpush1.bf16.msra.mxu1 %v1800_v11 }
  0x59   : > { %1022 = vmatprep.subr.bf16.mxu1 %v1801_v14  ;;  %626 = vperm.xlu1 %1776, %v564_v54  }
  0x5a   : > { %1665 = vmatmul.mubr.msk.bf16.gmra.mrb[4].mxu0 %vm974_vm1, %v1845_v23 }
  0x5b   : > { %1171 = vmatprep.mubr.bf16.mxu0 %v1975_v49 }
  0x5c   : > { %1023 = vmatpush1.bf16.msra.mxu1 %v1803_v15 }
  0x5d   : > { %1024 = vmatprep.subr.bf16.mxu1 %v1804_v17 }
  0x60   : > { %1025 = vmatpush1.bf16.msra.mxu1 %v1806_v19 }
  0x61   : > { %1026 = vmatprep.subr.bf16.mxu1 %v1807_v20 }
  0x62   : > { %1666 = vmatmul.mubr.msk.bf16.gmra.mrb[8].mxu0 %vm974_vm1, %v1849_v33 }
  0x63   : > { %1181 = vmatprep.mubr.bf16.mxu0 %v1975_v49 }
  0x64   : > { %1027 = vmatpush1.bf16.msra.mxu1 %v1809_v21 }
  0x65   : > { %1028 = vmatprep.subr.bf16.mxu1 %v1812_v22 }
  0x68   : > { %1029 = vmatpush1.bf16.msra.mxu1 %v1815_v26 }
  0x69   : > { %1030 = vmatprep.subr.bf16.mxu1 %v1818_v27 }
  0x6a   : > { %1667 = vmatmul.mubr.msk.bf16.gmra.mrb[12].mxu0 %vm974_vm1, %v1853_v42 }
  0x6b   : > { %1191 = vmatprep.mubr.bf16.mxu0 %v1975_v49 }
  0x6c   : > { %1031 = vmatpush1.bf16.msra.mxu1 %v1821_v30 }
  0x6d   : > { %1032 = vmatprep.subr.bf16.mxu1 %v1824_v31 }
  0x70   : > { %1033 = vmatpush1.bf16.msra.mxu1 %v1827_v35 }
  0x71   : > { %1034 = vmatprep.subr.bf16.mxu1 %v1830_v36 }
  0x72   : > { %1668 = vmatmul.mubr.msk.bf16.gmra.mrb[16].mxu0 %vm974_vm1, %v1857_v51 }
  0x73   : > { %1201 = vmatprep.mubr.bf16.mxu0 %v1975_v49 }
  0x74   : > { %1035 = vmatpush1.bf16.msra.mxu1 %v1833_v39 }
  0x75   : > { %1036 = vmatprep.subr.bf16.mxu1 %v1835_v40 }
  0x78   : > { %1037 = vmatpush1.bf16.msra.mxu1 %v1838_v44 }
  0x7a   : > { %1669 = vmatmul.mubr.msk.bf16.gmra.mrb[20].mxu0 %vm974_vm1, %v1861_v57 }
  0x7b   : > { %1039 = vmatmul.mubr.bf16.vlgmr.msra.gmra.mrb[0].mxu1 %v1839_v47  ;;  %1211 = vmatprep.mubr.bf16.mxu0 %v1975_v49 }
  0x7c   : > { %1048 = vmatprep.mubr.bf16.mxu1 %v1843_v48 }
  0x82   : > { %1670 = vmatmul.mubr.msk.bf16.gmra.mrb[24].mxu0 %vm974_vm1, %v1865_v60 }
  0x83   : > { %1049 = vmatmul.mubr.bf16.gmra.mrb[4].mxu1 %v1846_v55  ;;  %1221 = vmatprep.mubr.bf16.mxu0 %v1975_v49  ;;  %v1859_v49 = vld [vmem:[%s2541_s1 + $0x7c] ss:$12 sps:$4 sm:$0xff]  }
  0x84   : > { %1058 = vmatprep.mubr.bf16.mxu1 %v1847_v56 }
  0x8a   : > { %1671 = vmatmul.mubr.msk.bf16.gmra.mrb[28].mxu0 %vm974_vm1, %v1869_v63 }
  0x8b   : > { %1059 = vmatmul.mubr.bf16.gmra.mrb[8].mxu1 %v1850_v58 }
  0x8c   : > { %1068 = vmatprep.mubr.bf16.mxu1 %v1851_v59 }
  0x93   : > { %1069 = vmatmul.mubr.bf16.gmra.mrb[12].mxu1 %v1854_v61 }
  0x94   : > { %1078 = vmatprep.mubr.bf16.mxu1 %v1855_v62 }
  0x9b   : > { %1079 = vmatmul.mubr.bf16.gmra.mrb[16].mxu1 %v1858_v0 }
  0x9c   : > { %1088 = vmatprep.mubr.bf16.mxu1 %v1859_v49 }
  0xa3   : > { %1089 = vmatmul.mubr.bf16.gmra.mrb[20].mxu1 %v1862_v1 }
  0xa4   : > { %1098 = vmatprep.mubr.bf16.mxu1 %v1863_v2 }
  0xab   : > { %1099 = vmatmul.mubr.bf16.gmra.mrb[24].mxu1 %v1866_v3 }
  0xac   : > { %1108 = vmatprep.mubr.bf16.mxu1 %v1867_v4 }
  0xb3   : > { %1109 = vmatmul.mubr.bf16.gmra.mrb[28].mxu1 %v1870_v5 }
  0xb7   : > { %v572_v18 = vpop.permute.xlu0 %571  ;;  %v582_v22 = vpop.permute.xlu1 %581 }
  0xbb   : > { %v577_v25 = vpop.permute.xlu0 %576 }
  0xbc   : > { %v587_v36 = vpop.permute.xlu1 %586 }
  0xc0   : > { %v592_v41 = vpop.permute.xlu0 %591 }
  0xc1   : > { %v597_v44 = vpop.permute.xlu1 %596 }
  0xc4   : > { %v602_v56 = vpop.permute.xlu0 %601 }
  0xc8   : > { %v607_v61 = vpop.permute.xlu1 %606 }
  0xc9   : > { %v2372_v3 = vpop.permute.xlu0 %631 }
 0x125   : > { %v1153_v6 = vpop.f32.mrb[0].mxu0 }
 0x126   : > { %v1155_v7 = vpop.f32.mrb[1].mxu0 }
 0x127   : > { %v1157_v8 = vpop.f32.mrb[2].mxu0 }
 0x128   : > { %v1159_v9 = vpop.f32.mrb[3].mxu0 }
 0x12d   : > { %v1163_v10 = vpop.f32.mrb[4].mxu0 }
 0x12e   : > { %v1165_v11 = vpop.f32.mrb[5].mxu0 }
 0x12f   : > { %v1167_v12 = vpop.f32.mrb[6].mxu0 }
 0x130   : > { %v1169_v13 = vpop.f32.mrb[7].mxu0 }
 0x135   : > { %v1173_v14 = vpop.f32.mrb[8].mxu0 }
 0x136   : > { %v1175_v15 = vpop.f32.mrb[9].mxu0 }
 0x137   : > { %v1177_v16 = vpop.f32.mrb[10].mxu0 }
 0x138   : > { %v1179_v17 = vpop.f32.mrb[11].mxu0 }
 0x13d   : > { %v2332_v19 = vpop.f32.mrb[12].mxu0 }
 0x13e   : > { %v2334_v20 = vpop.f32.mrb[13].mxu0 }
 0x13f   : > { %v2336_v21 = vpop.f32.mrb[14].mxu0 }
 0x140   : > { %v2338_v23 = vpop.f32.mrb[15].mxu0 }
 0x145   : > { %v2342_v33 = vpop.f32.mrb[16].mxu0 }
 0x146   : > { %v2346_v37 = vpop.f32.mrb[17].mxu0 }
 0x147   : > { %v2350_v39 = vpop.f32.mrb[18].mxu0 }
 0x148   : > { %v2354_v42 = vpop.f32.mrb[19].mxu0 }
 0x14d   : > { %v2358_v53 = vpop.f32.mrb[20].mxu0 }
 0x14e   : > { %v1040_v24 = vpop.f32.mrb[0].mxu1  ;;  %v2362_v57 = vpop.f32.mrb[21].mxu0 }
 0x14f   : > { %v1041_v26 = vadd.f32 %v1040_v24, %v572_v18  ;;  %v1042_v27 = vpop.f32.mrb[1].mxu1  ;;  %v2366_v59 = vpop.f32.mrb[22].mxu0 }
 0x150   : > { %v1043_v28 = vadd.f32 %v1042_v27, %v572_v18  ;;  %v1044_v29 = vpop.f32.mrb[2].mxu1  ;;  %v2370_v62 = vpop.f32.mrb[23].mxu0 }
 0x151   : > { %v2340_v30 = vadd.f32 %v1153_v6, %v1041_v26  ;;  %v1045_v31 = vadd.f32 %v1044_v29, %v577_v25  ;;  %v1046_v32 = vpop.f32.mrb[3].mxu1 }
 0x152   : > { %v2344_v34 = vadd.f32 %v1155_v7, %v1043_v28  ;;  %v1047_v35 = vadd.f32 %v1046_v32, %v577_v25  ;;  %v2384_v25 = vpop.permute.xlu0 %641 }
 0x153   : > { %v2348_v38 = vadd.f32 %v1157_v8, %v1045_v31 }
 0x154   : > { %v2352_v40 = vadd.f32 %v1159_v9, %v1047_v35 }
 0x155   : > { %v2374_v7 = vpop.f32.mrb[24].mxu0 }
 0x156   : > { %v1050_v43 = vpop.f32.mrb[4].mxu1 }
 0x157   : > { %v1051_v45 = vadd.f32 %v1050_v43, %v582_v22  ;;  %v1052_v46 = vpop.f32.mrb[5].mxu1 }
 0x158   : > { %v1053_v47 = vadd.f32 %v1052_v46, %v582_v22  ;;  %v1054_v48 = vpop.f32.mrb[6].mxu1  ;;  %v612_v46 = vpop.permute.xlu0 %611 }
 0x159   : > { %v2356_v50 = vadd.f32 %v1163_v10, %v1051_v45  ;;  %v1055_v51 = vadd.f32 %v1054_v48, %v587_v36  ;;  %v1056_v52 = vpop.f32.mrb[7].mxu1  ;;  %v2376_v10 = vpop.permute.xlu1 %636 }
 0x15a   : > { %v2360_v54 = vadd.f32 %v1165_v11, %v1053_v47  ;;  %v1057_v55 = vadd.f32 %v1056_v52, %v587_v36  ;;  %v2378_v11 = vpop.f32.mrb[25].mxu0 }
 0x15b   : > { %v2364_v58 = vadd.f32 %v1167_v12, %v1055_v51  ;;  %v1233_v51 = vmul.f32 0.5, %v2344_v34 }
 0x15c   : > { %v2368_v60 = vadd.f32 %v1169_v13, %v1057_v55  ;;  %v2380_v13 = vpop.f32.mrb[26].mxu0  ;;  %v1234_v55 = vmul.f32 0.5, %v2348_v38 }
 0x15d   : > { %v2382_v22 = vpop.f32.mrb[27].mxu0  ;;  %v2386_v29 = vpop.permute.xlu1 %646 }
 0x15e   : > { %v1060_v63 = vpop.f32.mrb[8].mxu1  ;;  %v2389_v35 = vpop.f32.mrb[28].mxu0 }
 0x15f   : > { %v1061_v0 = vadd.f32 %v1060_v63, %v592_v41  ;;  %v1062_v49 = vpop.f32.mrb[9].mxu1  ;;  %v2392_v36 = vpop.f32.mrb[29].mxu0 }
 0x160   : > { %v1063_v1 = vadd.f32 %v1062_v49, %v592_v41  ;;  %v1064_v2 = vpop.f32.mrb[10].mxu1  ;;  %v2395_v43 = vpop.f32.mrb[30].mxu0 }
 0x161   : > { %v1174_v4 = vadd.f32 %v1173_v14, %v1061_v0  ;;  %v1065_v5 = vadd.f32 %v1064_v2, %v597_v44  ;;  %v1066_v6 = vpop.f32.mrb[11].mxu1  ;;  %v2399_v47 = vpop.f32.mrb[31].mxu0  ;;  %v1236_v0 = vmul.f32 0.5, %v2356_v50 }
 0x162   : > { %v1176_v8 = vadd.f32 %v1175_v15, %v1063_v1  ;;  %v1067_v9 = vadd.f32 %v1066_v6, %v597_v44  ;;  %v1232_v44 = vmul.f32 0.5, %v2340_v30  ;;  %v617_v48 = vpop.permute.xlu1 %616 }
 0x163   : > { %v1178_v12 = vadd.f32 %v1177_v16, %v1065_v5  ;;  %v1240_v34 = vmul.f32 0.5, %v1174_v4  ;;  %v1238_v4 = vmul.f32 0.5, %v2364_v58 }
 0x164   : > { %v1180_v18 = vadd.f32 %v1179_v17, %v1067_v9  ;;  %1871 = vtanh.f32 %v1232_v44  ;;  %v1241_v38 = vmul.f32 0.5, %v1176_v8 }
 0x165   : > { %1873 = vtanh.f32 %v1233_v51 }
 0x166   : > { %v1070_v24 = vpop.f32.mrb[12].mxu1  ;;  %1875 = vtanh.f32 %v1234_v55  ;;  %v1243_v6 = vmul.f32 0.5, %v1180_v18 }
 0x167   : > { %v1071_v14 = vadd.f32 %v1070_v24, %v602_v56  ;;  %v1072_v26 = vpop.f32.mrb[13].mxu1 }
 0x168   : > { %v1073_v27 = vadd.f32 %v1072_v26, %v602_v56  ;;  %v1074_v28 = vpop.f32.mrb[14].mxu1 }
 0x169   : > { %v1184_v15 = vadd.f32 %v2332_v19, %v1071_v14  ;;  %v1075_v31 = vadd.f32 %v1074_v28, %v607_v61  ;;  %v1076_v32 = vpop.f32.mrb[15].mxu1 }
 0x16a   : > { %v1186_v16 = vadd.f32 %v2334_v20, %v1073_v27  ;;  %v1077_v17 = vadd.f32 %v1076_v32, %v607_v61  ;;  %v1235_v61 = vmul.f32 0.5, %v2352_v40  ;;  %v622_v40 = vpop.permute.xlu0 %621 }
 0x16b   : > { %v1188_v41 = vadd.f32 %v2336_v21, %v1075_v31  ;;  %v1244_v28 = vmul.f32 0.5, %v1184_v15 }
 0x16c   : > { %v1190_v45 = vadd.f32 %v2338_v23, %v1077_v17  ;;  %1877 = vtanh.f32 %v1235_v61  ;;  %v1245_v58 = vmul.f32 0.5, %v1186_v16 }
 0x16d   : > { %1879 = vtanh.f32 %v1236_v0  ;;  %v1246_v17 = vmul.f32 0.5, %v1188_v41 }
 0x16e   : > { %v1080_v19 = vpop.f32.mrb[16].mxu1  ;;  %1881 = vtanh.f32 %v1240_v34  ;;  %v1872_v18 = vpop.eup %1871 }
 0x16f   : > { %v1081_v52 = vadd.f32 %v1080_v19, %v612_v46  ;;  %v1082_v20 = vpop.f32.mrb[17].mxu1  ;;  %1883 = vtanh.f32 %v1241_v38  ;;  %v1280_v44 = vmul.f32 0.5, %v1872_v18 }
 0x170   : > { %v1083_v56 = vadd.f32 %v1082_v20, %v612_v46  ;;  %v1084_v21 = vpop.f32.mrb[18].mxu1  ;;  %v1247_v46 = vmul.f32 0.5, %v1190_v45 }
 0x171   : > { %v1194_v30 = vadd.f32 %v2342_v33, %v1081_v52  ;;  %v1085_v63 = vadd.f32 %v1084_v21, %v617_v48  ;;  %v1086_v23 = vpop.f32.mrb[19].mxu1  ;;  %v1242_v33 = vmul.f32 0.5, %v1178_v12  ;;  %v2430_v55 = vadd.f32 0.5, %v1280_v44  ;;  %v1337_v44 = vld [vmem:[%s2456_s18 + $0x8] sm:$0xff] }
 0x172   : > { %v2407_v49 = vadd.f32 %v2346_v37, %v1083_v56  ;;  %v1087_v1 = vadd.f32 %v1086_v23, %v617_v48  ;;  %v1237_v37 = vmul.f32 0.5, %v2360_v54 }
 0x173   : > { %v2410_v2 = vadd.f32 %v2350_v39, %v1085_v63  ;;  %v627_v39 = vpop.permute.xlu1 %626  ;;  %1885 = vtanh.f32 %v1242_v33  ;;  %v1248_v15 = vmul.f32 0.5, %v1194_v30 }
 0x174   : > { %v2413_v5 = vadd.f32 %v2354_v42, %v1087_v1  ;;  %v1239_v42 = vmul.f32 0.5, %v2368_v60  ;;  %1887 = vtanh.f32 %v1243_v6  ;;  %v1249_v1 = vmul.f32 0.5, %v2407_v49 }
 0x175   : > { %1889 = vtanh.f32 %v1237_v37 }
 0x176   : > { %v1090_v50 = vpop.f32.mrb[20].mxu1  ;;  %1891 = vtanh.f32 %v1238_v4 }
 0x177   : > { %v1091_v9 = vadd.f32 %v1090_v50, %v622_v40  ;;  %v1092_v24 = vpop.f32.mrb[21].mxu1  ;;  %1893 = vtanh.f32 %v1239_v42  ;;  %v1251_v50 = vmul.f32 0.5, %v2413_v5 }
 0x178   : > { %v1093_v14 = vadd.f32 %v1092_v24, %v622_v40  ;;  %v1094_v8 = vpop.f32.mrb[22].mxu1  ;;  %1895 = vtanh.f32 %v1244_v28  ;;  %v1250_v40 = vmul.f32 0.5, %v2410_v2 }
 0x179   : > { %v1204_v26 = vadd.f32 %v2358_v53, %v1091_v9  ;;  %v1095_v12 = vadd.f32 %v1094_v8, %v627_v39  ;;  %v1096_v27 = vpop.f32.mrb[23].mxu1  ;;  %v1874_v53 = vpop.eup %1873  ;;  %1897 = vtanh.f32 %v1245_v58 }
 0x17a   : > { %v2420_v54 = vadd.f32 %v2362_v57, %v1093_v14  ;;  %v1097_v31 = vadd.f32 %v1096_v27, %v627_v39  ;;  %v1876_v19 = vpop.eup %1875  ;;  %v1281_v52 = vmul.f32 0.5, %v1874_v53  ;;  %1899 = vtanh.f32 %v1246_v17  ;;  %v1336_v53 = vld [vmem:[%s2456_s18] sm:$0xff] }
 0x17b   : > { %v2423_v32 = vadd.f32 %v2366_v59, %v1095_v12  ;;  %v1878_v48 = vpop.eup %1877  ;;  %1901 = vtanh.f32 %v1247_v46  ;;  %v1282_v30 = vmul.f32 0.5, %v1876_v19  ;;  %v1252_v9 = vmul.f32 0.5, %v1204_v26 }
 0x17c   : > { %v2426_v60 = vadd.f32 %v2370_v62, %v1097_v31  ;;  %v1880_v59 = vpop.eup %1879  ;;  %1903 = vtanh.f32 %v1248_v15  ;;  %v1305_v6 = vadd.f32 0.5, %v1281_v52  ;;  %v1339_v52 = vld [vmem:[%s2456_s18 + $0x18] sm:$0xff] }
 0x17d   : > { %v1882_v20 = vpop.eup %1881  ;;  %v1306_v37 = vadd.f32 0.5, %v1282_v30  ;;  %v2450_v42 = vmul.f32 0.5, %v1880_v59 }
 0x17e   : > { %v1100_v57 = vpop.f32.mrb[24].mxu1  ;;  %v1884_v61 = vpop.eup %1883 }
 0x17f   : > { %v1101_v16 = vadd.f32 %v1100_v57, %v2372_v3  ;;  %v1102_v51 = vpop.f32.mrb[25].mxu1  ;;  %v1886_v0 = vpop.eup %1885 }
 0x180   : > { %v1103_v41 = vadd.f32 %v1102_v51, %v2372_v3  ;;  %v1104_v62 = vpop.f32.mrb[26].mxu1  ;;  %v1283_v3 = vmul.f32 0.5, %v1878_v48  ;;  %v1888_v38 = vpop.eup %1887  ;;  %v1253_v48 = vmul.f32 0.5, %v2420_v54 }
 0x181   : > { %v1214_v45 = vadd.f32 %v2374_v7, %v1101_v16  ;;  %v1105_v56 = vadd.f32 %v1104_v62, %v2376_v10  ;;  %v1106_v21 = vpop.f32.mrb[27].mxu1  ;;  %v1288_v7 = vmul.f32 0.5, %v1882_v20  ;;  %v1291_v2 = vmul.f32 0.5, %v1888_v38 }
 0x182   : > { %v1216_v63 = vadd.f32 %v2378_v11, %v1103_v41  ;;  %v1107_v23 = vadd.f32 %v1106_v21, %v2376_v10  ;;  %v1890_v11 = vpop.eup %1889  ;;  %v1289_v10 = vmul.f32 0.5, %v1884_v61  ;;  %v1307_v39 = vadd.f32 0.5, %v1283_v3 }
 0x183   : > { %1905 = vtanh.f32 %v1214_v45  ;;  %v1218_v34 = vadd.f32 %v2380_v13, %v1105_v56  ;;  %v2445_v49 = vpop.eup %1891  ;;  %v1290_v13 = vmul.f32 0.5, %v1886_v0  ;;  %v1312_v5 = vadd.f32 0.5, %v1288_v7 }
 0x184   : > { %1907 = vtanh.f32 %v1216_v63  ;;  %v1220_v33 = vadd.f32 %v2382_v22, %v1107_v23  ;;  %v2447_v4 = vpop.eup %1893  ;;  %v1313_v18 = vadd.f32 0.5, %v1289_v10  ;;  %v1315_v57 = vadd.f32 0.5, %v1291_v2  ;;  %v1340_v10 = vld [vmem:[%s2456_s18 + $0x20] sm:$0xff] }
 0x185   : > { %1909 = vtanh.f32 %v1218_v34  ;;  %v1896_v8 = vpop.eup %1895  ;;  %v1314_v46 = vadd.f32 0.5, %v1290_v13  ;;  %v1285_v59 = vmul.f32 0.5, %v1890_v11  ;;  %v1254_v41 = vmul.f32 0.5, %v2423_v32 }
 0x186   : > { %1911 = vtanh.f32 %v1220_v33  ;;  %v1110_v24 = vpop.f32.mrb[28].mxu1  ;;  %v1898_v26 = vpop.eup %1897  ;;  %v1344_v20 = vmul.f32 %v1336_v53, %v1312_v5  ;;  %v1255_v45 = vmul.f32 0.5, %v2426_v60  ;;  %v1292_v21 = vmul.f32 0.5, %v1896_v8 }
 0x187   : > { %1913 = vtanh.f32 %v1249_v1  ;;  %v1111_v22 = vadd.f32 %v1110_v24, %v2384_v25  ;;  %v1112_v14 = vpop.f32.mrb[29].mxu1  ;;  %v1900_v17 = vpop.eup %1899  ;;  %v1347_v30 = vmul.f32 %v1339_v52, %v1315_v57  ;;  %v1293_v63 = vmul.f32 0.5, %v1898_v26 }
 0x188   : > { %1915 = vtanh.f32 %v1250_v40  ;;  %v1113_v12 = vadd.f32 %v1112_v14, %v2384_v25  ;;  %v1114_v27 = vpop.f32.mrb[30].mxu1  ;;  %v1902_v15 = vpop.eup %1901  ;;  %v1316_v40 = vadd.f32 0.5, %v1292_v21  ;;  %v1308_v13 = vadd.f32 0.5, %v2450_v42 }
 0x189   : > { %1917 = vtanh.f32 %v1251_v50  ;;  %v1224_v28 = vadd.f32 %v2389_v35, %v1111_v22  ;;  %v1115_v31 = vadd.f32 %v1114_v27, %v2386_v29  ;;  %v1116_v58 = vpop.f32.mrb[31].mxu1  ;;  %v1338_v35 = vld [vmem:[%s2456_s18 + $0x10] sm:$0xff]  ;;  %v2465_v51 = vpop.eup %1903  ;;  %v1295_v1 = vmul.f32 0.5, %v1902_v15 }
 0x18a   : > { %1919 = vtanh.f32 %v1252_v9  ;;  %v1226_v25 = vadd.f32 %v2392_v36, %v1113_v12  ;;  %v1117_v19 = vadd.f32 %v1116_v58, %v2386_v29  ;;  %v1345_v29 = vmul.f32 %v1337_v44, %v1313_v18  ;;  %v1341_v9 = vld [vmem:[%s2456_s18 + $0x28] sm:$0xff]  ;;  %v1342_v22 = vld [vmem:[%s2456_s18 + $0x30] sm:$0xff]  ;;  %v1343_v12 = vld [vmem:[%s2456_s18 + $0x38] sm:$0xff] }
 0x18b   : > { %1921 = vtanh.f32 %v1224_v28  ;;  %v1228_v16 = vadd.f32 %v2395_v43, %v1115_v31  ;;  %v1346_v54 = vmul.f32 %v1338_v35, %v1314_v46  ;;  %v1317_v50 = vadd.f32 0.5, %v1293_v63 }
 0x18c   : > { %1923 = vtanh.f32 %v1226_v25  ;;  %v1230_v62 = vadd.f32 %v2399_v47, %v1117_v19  ;;  %v1294_v47 = vmul.f32 0.5, %v1900_v17  ;;  %v1309_v2 = vadd.f32 0.5, %v1285_v59 }
 0x18d   : > { %v1906_v36 = vpop.eup %1905  ;;  %1925 = vtanh.f32 %v1228_v16  ;;  %v1319_v14 = vadd.f32 0.5, %v1295_v1  ;;  %v1348_v5 = vmul.f32 %v1340_v10, %v1316_v40  ;;  %v1349_v28 = vmul.f32 %v1341_v9, %v1317_v50 }
 0x18e   : > { %v1908_v56 = vpop.eup %1907  ;;  %v1352_v43 = vmul.f32 %v1906_v36, %v2430_v55  ;;  %1927 = vtanh.f32 %v1230_v62  ;;  %v1286_v55 = vmul.f32 0.5, %v2445_v49  ;;  %v1318_v24 = vadd.f32 0.5, %v1294_v47 }
 0x18f   : > { %v1910_v61 = vpop.eup %1909  ;;  %1929 = vtanh.f32 %v1253_v48  ;;  %v1353_v32 = vmul.f32 %v1908_v56, %v1305_v6  ;;  %v1287_v6 = vmul.f32 0.5, %v2447_v4  ;;  %v1296_v42 = vmul.f32 0.5, %v2465_v51 }
 0x190   : > { %v1912_v23 = vpop.eup %1911  ;;  %1931 = vtanh.f32 %v1254_v41  ;;  %v1360_v0 = vadd.f32 %v1352_v43, %v1344_v20  ;;  %v1354_v3 = vmul.f32 %v1910_v61, %v1306_v37  ;;  %v1310_v8 = vadd.f32 0.5, %v1286_v55 }
 0x191   : > { %v1914_v60 = vpop.eup %1913  ;;  %1933 = vtanh.f32 %v1255_v45  ;;  %v1361_v34 = vadd.f32 %v1353_v32, %v1345_v29  ;;  %v1355_v38 = vmul.f32 %v1912_v23, %v1307_v39  ;;  %v1311_v18 = vadd.f32 0.5, %v1287_v6 }
 0x192   : > { %v1916_v7 = vpop.eup %1915  ;;  %1935 = vtanh.f32 %v1360_v0  ;;  %1384 = vst [vmem:[%s2474_s17] sm:$0xff] %v1360_v0  ;;  %v1362_v33 = vadd.f32 %v1354_v3, %v1346_v54  ;;  %v1350_v17 = vmul.f32 %v1342_v22, %v1318_v24  ;;  %v1297_v53 = vmul.f32 0.5, %v1914_v60 }
 0x193   : > { %v1918_v11 = vpop.eup %1917  ;;  %1937 = vtanh.f32 %v1361_v34  ;;  %1385 = vst [vmem:[%s2474_s17 + $0x8] sm:$0xff] %v1361_v34  ;;  %v1363_v37 = vadd.f32 %v1355_v38, %v1347_v30  ;;  %v1351_v19 = vmul.f32 %v1343_v12, %v1319_v14  ;;  %v1298_v15 = vmul.f32 0.5, %v1916_v7 }
 0x194   : > { %v1920_v49 = vpop.eup %1919  ;;  %1939 = vtanh.f32 %v1362_v33  ;;  %1386 = vst [vmem:[%s2474_s17 + $0x10] sm:$0xff] %v1362_v33  ;;  %v1299_v16 = vmul.f32 0.5, %v1918_v11  ;;  %v1320_v52 = vadd.f32 0.5, %v1296_v42  ;;  %v1321_v36 = vadd.f32 0.5, %v1297_v53 }
 0x195   : > { %v1922_v39 = vpop.eup %1921  ;;  %1941 = vtanh.f32 %v1363_v37  ;;  %1387 = vst [vmem:[%s2474_s17 + $0x18] sm:$0xff] %v1363_v37  ;;  %v1322_v29 = vadd.f32 0.5, %v1298_v15  ;;  %v1300_v61 = vmul.f32 0.5, %v1920_v49 }
 0x196   : > { %v1924_v4 = vpop.eup %1923  ;;  %v1356_v27 = vmul.f32 %v1922_v39, %v1308_v13  ;;  %v1323_v54 = vadd.f32 0.5, %v1299_v16 }
 0x197   : > { %v1926_v26 = vpop.eup %1925  ;;  %v1357_v31 = vmul.f32 %v1924_v4, %v1309_v2  ;;  %v1324_v0 = vadd.f32 0.5, %v1300_v61 }
 0x198   : > { %v1928_v58 = vpop.eup %1927  ;;  %v1364_v44 = vadd.f32 %v1356_v27, %v1348_v5  ;;  %v1358_v46 = vmul.f32 %v1926_v26, %v1310_v8 }
 0x199   : > { %v1930_v25 = vpop.eup %1929  ;;  %v1365_v35 = vadd.f32 %v1357_v31, %v1349_v28  ;;  %v1359_v57 = vmul.f32 %v1928_v58, %v1311_v18 }
 0x19a   : > { %v1932_v48 = vpop.eup %1931  ;;  %1943 = vtanh.f32 %v1364_v44  ;;  %1388 = vst [vmem:[%s2474_s17 + $0x20] sm:$0xff] %v1364_v44  ;;  %v1366_v59 = vadd.f32 %v1358_v46, %v1350_v17  ;;  %v1301_v63 = vmul.f32 0.5, %v1930_v25 }
 0x19b   : > { %v1934_v51 = vpop.eup %1933  ;;  %1945 = vtanh.f32 %v1365_v35  ;;  %1389 = vst [vmem:[%s2474_s17 + $0x28] sm:$0xff] %v1365_v35  ;;  %v1367_v41 = vadd.f32 %v1359_v57, %v1351_v19  ;;  %v1302_v23 = vmul.f32 0.5, %v1932_v48 }
 0x19c   : > { %v1936_v62 = vpop.eup %1935  ;;  %1947 = vtanh.f32 %v1366_v59  ;;  %1390 = vst [vmem:[%s2474_s17 + $0x30] sm:$0xff] %v1366_v59  ;;  %v1303_v47 = vmul.f32 0.5, %v1934_v51  ;;  %v1325_v60 = vadd.f32 0.5, %v1301_v63 }
 0x19d   : > { %v1938_v20 = vpop.eup %1937  ;;  %v1376_v45 = vmul.f32 %v1936_v62, %v1320_v52  ;;  %1949 = vtanh.f32 %v1367_v41  ;;  %1391 = vst [vmem:[%s2474_s17 + $0x38] sm:$0xff] %v1367_v41  ;;  %v1326_v34 = vadd.f32 0.5, %v1302_v23 }
 0x19e   : > { %v1940_v56 = vpop.eup %1939  ;;  %v1377_v21 = vmul.f32 %v1938_v20, %v1321_v36  ;;  %v1327_v55 = vadd.f32 0.5, %v1303_v47 }
 0x19f   : > { %v1942_v43 = vpop.eup %1941  ;;  %1392 = vst [vmem:[%s2492_s11] sm:$0xff] %v1376_v45  ;;  %v1378_v30 = vmul.f32 %v1940_v56, %v1322_v29 }
 0x1a0   : > { %1393 = vst [vmem:[%s2492_s11 + $0x8] sm:$0xff] %v1377_v21  ;;  %v1379_v32 = vmul.f32 %v1942_v43, %v1323_v54 }
 0x1a1   : > { %1394 = vst [vmem:[%s2492_s11 + $0x10] sm:$0xff] %v1378_v30 }
 0x1a2   : > { %1395 = vst [vmem:[%s2492_s11 + $0x18] sm:$0xff] %v1379_v32 }
 0x1a4   : > { %v1944_v3 = vpop.eup %1943  ;;  %1410 = sbr.rel (!%p2041_p5) target bundleno = 435 (0x1b3), region = 101 }
 0x1a5   : > { %v1946_v1 = vpop.eup %1945  ;;  %v1380_v38 = vmul.f32 %v1944_v3, %v1324_v0 }
 0x1a6   : > { %v1948_v7 = vpop.eup %1947  ;;  %v1381_v40 = vmul.f32 %v1946_v1, %v1325_v60  ;;  %v1426_v10 = vld [vmem:[%s2492_s11] sm:$0xff] (%p2041_p5) }
 0x1a7   : > { %v1950_v33 = vpop.eup %1949  ;;  %1396 = vst [vmem:[%s2492_s11 + $0x20] sm:$0xff] %v1380_v38  ;;  %v1382_v11 = vmul.f32 %v1948_v7, %v1326_v34  ;;  %v1428_v50 = vld [vmem:[%s2492_s11 + $0x8] sm:$0xff] (%p2041_p5)  ;;  %1427 = vst [vmem:[%s1413_s15] sm:$0xff] (%p2041_p5), %v1426_v10 }
 0x1a8   : > { %1397 = vst [vmem:[%s2492_s11 + $0x28] sm:$0xff] %v1381_v40  ;;  %v1383_v6 = vmul.f32 %v1950_v33, %v1327_v55  ;;  %v1430_v37 = vld [vmem:[%s2492_s11 + $0x10] sm:$0xff] (%p2041_p5)  ;;  %1429 = vst [vmem:[%s1413_s15 + $0x8] sm:$0xff] (%p2041_p5), %v1428_v50 }
 0x1a9   : > { %1398 = vst [vmem:[%s2492_s11 + $0x30] sm:$0xff] %v1382_v11  ;;  %v1432_v49 = vld [vmem:[%s2492_s11 + $0x18] sm:$0xff] (%p2041_p5)  ;;  %1431 = vst [vmem:[%s1413_s15 + $0x20] sm:$0xff] (%p2041_p5), %v1430_v37 }
 0x1aa   : > { %1399 = vst [vmem:[%s2492_s11 + $0x38] sm:$0xff] %v1383_v6  ;;  %1433 = vst [vmem:[%s1413_s15 + $0x28] sm:$0xff] (%p2041_p5), %v1432_v49 }
 0x1ae   : > { %v1434_v13 = vld [vmem:[%s2492_s11 + $0x20] sm:$0xff] }
 0x1af   : > { %v1436_v9 = vld [vmem:[%s2492_s11 + $0x28] sm:$0xff]  ;;  %1435 = vst [vmem:[%s1413_s15 + $0x40] sm:$0xff] %v1434_v13 }
 0x1b0   : > { %1437 = vst [vmem:[%s1413_s15 + $0x48] sm:$0xff] %v1436_v9  ;;  %v1438_v24 = vld [vmem:[%s2492_s11 + $0x30] sm:$0xff] }
 0x1b1   : > { %v1440_v39 = vld [vmem:[%s2492_s11 + $0x38] sm:$0xff]  ;;  %1439 = vst [vmem:[%s1413_s15 + $0x60] sm:$0xff] %v1438_v24 }
 0x1b2   : > { %1441 = vst [vmem:[%s1413_s15 + $0x68] sm:$0xff] %v1440_v39 }
 0x1b3 PF: > { %1447 = sbr.rel (!%p2041_p5) target bundleno = 442 (0x1ba), region = 124  ;;  %s1683_s16 = sshll.u32 (%p2041_p5), %s2022_s21, 4  ;;  %v1463_v2 = vld [vmem:[%s2474_s17] sm:$0xff] (%p2041_p5)  ;;  %v1465_v22 = vld [vmem:[%s2474_s17 + $0x8] sm:$0xff] (%p2041_p5)  ;;  %v1467_v14 = vld [vmem:[%s2474_s17 + $0x10] sm:$0xff] (%p2041_p5) }
 0x1b4   : > { %s1450_s26 = scalar_lea.vmem (%p2041_p5), %s2545_s5, %s1683_s16  ;;  %v1469_v4 = vld [vmem:[%s2474_s17 + $0x18] sm:$0xff] (%p2041_p5)  ;;  %v1471_v8 = vld [vmem:[%s2474_s17 + $0x20] sm:$0xff] (%p2041_p5)  ;;  %v1473_v5 = vld [vmem:[%s2474_s17 + $0x28] sm:$0xff] (%p2041_p5) }
 0x1b5   : > { %1464 = vst [vmem:[%s1450_s26] sm:$0xff] (%p2041_p5), %v1463_v2  ;;  %1466 = vst [vmem:[%s1450_s26 + $0x8] sm:$0xff] (%p2041_p5), %v1465_v22  ;;  %v1475_v12 = vld [vmem:[%s2474_s17 + $0x30] sm:$0xff] (%p2041_p5)  ;;  %v1477_v27 = vld [vmem:[%s2474_s17 + $0x38] sm:$0xff] (%p2041_p5) }
 0x1b6   : > { %1468 = vst [vmem:[%s1450_s26 + $0x20] sm:$0xff] (%p2041_p5), %v1467_v14  ;;  %1470 = vst [vmem:[%s1450_s26 + $0x28] sm:$0xff] (%p2041_p5), %v1469_v4 }
 0x1b7   : > { %1472 = vst [vmem:[%s1450_s26 + $0x40] sm:$0xff] (%p2041_p5), %v1471_v8  ;;  %1474 = vst [vmem:[%s1450_s26 + $0x48] sm:$0xff] (%p2041_p5), %v1473_v5 }
 0x1b8   : > { %1476 = vst [vmem:[%s1450_s26 + $0x60] sm:$0xff] (%p2041_p5), %v1475_v12  ;;  %1478 = vst [vmem:[%s1450_s26 + $0x68] sm:$0xff] (%p2041_p5), %v1477_v27 }
 0x1ba PF: > { %p13_p10 = scmp.ge.s32.totalorder %s2025_s22, 4   ;;  %s2548_s18 = smov %s1969_s19 }
 0x1bb   : > { %s2549_s19 = smov %s2035_s25  ;;  %s2550_s20 = smov %s2025_s22 }
 0x1bc   :  { %15 = sbr.rel (!%p13_p10) target bundleno = 2 (0x2), region = 198 }

</bundles_post_ra>
